<compile_context>
chip_gen: v7x
topology: tpu7x:2x2x1
jax: 0.10.0
libtpu: 0.0.40
codegen_flags: <defaults>
</compile_context>

<pallas_src>
import math

import numpy as np
import jax
import jax.numpy as jnp
from jax import lax
from jax.experimental import pallas as pl
from jax.experimental.pallas import tpu as pltpu


# 48 MiB: below v7x's 64 MiB/TC physical VMEM, comfortable on v5e/v6e (128 MiB).
_VMEM_LIMIT_BYTES = 48 * 1024 * 1024


def _round_up(x, m):
    return (x + m - 1) // m * m


def _pick_tile_m(m8):
    """m8 is M rounded up to 8.  Small/medium M -> single tile; big M -> big tiles."""
    if m8 <= 512:
        return m8
    for cand in (512, 256, 128, 64, 32, 16, 8):
        if m8 % cand == 0:
            return cand
    return 8


def _pick_tile_k(k):
    if k <= 512 or k % 128 != 0:
        return k                      # single K step (block equals full K dim)
    for cand in (512, 256, 128):
        if k % cand == 0:
            return cand
    return k


def _pick_tile_n(n, mp):
    if n <= 128:
        return n                      # single full-width tile (legal: equals full dim)
    if n % 128 != 0:
        return 128                    # pad N up to a multiple of 128
    if mp <= 128:
        # small-M GEMMs (im2col fallbacks, pooled PPM bins): widen the N tile so the
        # call is a few big grid steps instead of many overhead-dominated tiny ones.
        for cand in (512, 256, 128):
            if n % cand == 0:
                return cand
    return 128


# ----------------------------------------------------------------------------------
# Pallas kernel 1: tiled GEMM with fused bias + ReLU (used for 1x1 convs / fallbacks)
# ----------------------------------------------------------------------------------
def matmul_bias(a, b, bias, relu=False):
    """relu?(a @ b + bias).  a:(M,K) b:(K,N) bias:(N,).  bf16 MXU, f32 accumulate."""
    M, K = a.shape
    _, N = b.shape

    m8 = _round_up(max(M, 1), 8)
    tm = _pick_tile_m(m8)
    Mp = _round_up(m8, tm)
    tn = _pick_tile_n(N, Mp)
    Np = _round_up(N, tn)
    tk = _pick_tile_k(K)
    n_k = K // tk

    a_p = a.astype(jnp.bfloat16)
    if Mp != M:
        a_p = jnp.pad(a_p, ((0, Mp - M), (0, 0)))
    b_p = b.astype(jnp.bfloat16)
    if Np != N:
        b_p = jnp.pad(b_p, ((0, 0), (0, Np - N)))
    bias_p = bias.astype(jnp.float32)
    if Np != N:
        bias_p = jnp.pad(bias_p, ((0, Np - N),))
    bias_p = bias_p.reshape(1, Np)

    def kernel(a_ref, b_ref, bias_ref, o_ref, acc_ref):
        k = pl.program_id(2)

        @pl.when(k == 0)
        def _():
            # fold the bias add into the accumulator init
            acc_ref[...] = jnp.broadcast_to(bias_ref[...], acc_ref.shape)

        acc_ref[...] += jnp.dot(a_ref[...], b_ref[...],
                                preferred_element_type=jnp.float32)

        @pl.when(k == pl.num_programs(2) - 1)
        def _():
            out = acc_ref[...]
            if relu:
                out = jnp.maximum(out, 0.0)
            o_ref[...] = out.astype(o_ref.dtype)

    out = pl.pallas_call(
        kernel,
        out_shape=jax.ShapeDtypeStruct((Mp, Np), jnp.float32),
        grid=(Mp // tm, Np // tn, n_k),
        in_specs=[
            pl.BlockSpec((tm, tk), lambda i, j, k: (i, k)),
            pl.BlockSpec((tk, tn), lambda i, j, k: (k, j)),
            pl.BlockSpec((1, tn), lambda i, j, k: (0, j)),
        ],
        out_specs=pl.BlockSpec((tm, tn), lambda i, j, k: (i, j)),
        scratch_shapes=[pltpu.VMEM((tm, tn), jnp.float32)],
        compiler_params=pltpu.CompilerParams(
            dimension_semantics=("parallel", "parallel", "arbitrary"),
            vmem_limit_bytes=_VMEM_LIMIT_BYTES,
        ),
    )(a_p, b_p, bias_p)
    return out[:M, :N]


# ----------------------------------------------------------------------------------
# Pallas kernel 2: direct 3x3 (dilated) "same" conv, no 9x im2col in HBM
# ----------------------------------------------------------------------------------
def conv3x3_direct(x, w, bias, dilation, relu):
    """3x3 conv, stride 1, padding == dilation.  x: NHWC, w: HWIO, bias: (Cout,).

    The 3 column taps are gathered once in the wrapper (3x the activation size instead
    of the 9x of full im2col); the 3 row taps are walked inside the kernel as aligned
    sublane slices of a per-image block, each feeding one MXU matmul accumulating into
    a VMEM f32 scratch.  Requires W % 8 == 0 so in-kernel row slices stay tile-aligned.
    """
    Nb, H, W, Cin = x.shape
    Cout = w.shape[-1]
    d = dilation
    HW = H * W
    Hp = H + 2 * d
    dW = d * W

    # column-tap gather: xcol[n, h', w, kj*Cin + c] = xpad[n, h', w + kj*d, c]
    xp = jnp.pad(x, ((0, 0), (d, d), (d, d), (0, 0)))
    xcol = jnp.concatenate([xp[:, :, j * d:j * d + W, :] for j in range(3)], axis=-1)
    xflat = xcol.reshape(Nb, Hp * W, 3 * Cin).astype(jnp.bfloat16)

    # weights: HWIO (3,3,Cin,Cout) -> (3 row taps, 3*Cin, Cout); (kj,ci) flattening
    # matches the xcol channel order.
    wrow = w.reshape(3, 3 * Cin, Cout).astype(jnp.bfloat16)
    bias2 = bias.reshape(1, Cout).astype(jnp.float32)

    tn = 128 if Cout % 128 == 0 else Cout

    def kernel(x_ref, w_ref, b_ref, o_ref, acc_ref):
        acc_ref[...] = jnp.dot(x_ref[0, 0:HW, :], w_ref[0],
                               preferred_element_type=jnp.float32)
        for ki in (1, 2):
            acc_ref[...] += jnp.dot(x_ref[0, ki * dW:ki * dW + HW, :], w_ref[ki],
                                    preferred_element_type=jnp.float32)
        out = acc_ref[...] + b_ref[...]
        if relu:
            out = jnp.maximum(out, 0.0)
        o_ref[...] = out[None].astype(o_ref.dtype)

    out = pl.pallas_call(
        kernel,
        out_shape=jax.ShapeDtypeStruct((Nb, HW, Cout), jnp.float32),
        grid=(Nb, Cout // tn),
        in_specs=[
            pl.BlockSpec((1, Hp * W, 3 * Cin), lambda b, j: (b, 0, 0)),
            pl.BlockSpec((3, 3 * Cin, tn), lambda b, j: (0, 0, j)),
            pl.BlockSpec((1, tn), lambda b, j: (0, j)),
        ],
        out_specs=pl.BlockSpec((1, HW, tn), lambda b, j: (b, 0, j)),
        scratch_shapes=[pltpu.VMEM((HW, tn), jnp.float32)],
        compiler_params=pltpu.CompilerParams(
            dimension_semantics=("parallel", "parallel"),
            vmem_limit_bytes=_VMEM_LIMIT_BYTES,
        ),
    )(xflat, wrow, bias2)
    return out.reshape(Nb, H, W, Cout)


# ----------------------------------------------------------------------------------
# Conv dispatcher / pooling / interpolation
# ----------------------------------------------------------------------------------
def conv2d_same(x, w, b, dilation=1, relu=False):
    """'same' convolution, stride 1 (padding = dilation * (k//2)).  x NHWC, w HWIO."""
    Nb, H, W, Cin = x.shape
    kh, kw, _, Cout = w.shape
    if kh == 1 and kw == 1:
        out = matmul_bias(x.reshape(-1, Cin), w.reshape(Cin, Cout), b, relu=relu)
        return out.reshape(Nb, H, W, Cout)
    if kh == 3 and kw == 3 and W % 8 == 0:
        return conv3x3_direct(x, w, b, dilation, relu)
    # TODO(synk): the W % 8 != 0 feature maps (<= 4x4 here) still use an explicit
    # im2col GEMM; at those sizes the 9x blow-up is a few hundred KB and irrelevant.
    p = dilation * (kh // 2)
    xp = jnp.pad(x, ((0, 0), (p, p), (p, p), (0, 0)))
    cols = [xp[:, ki * dilation:ki * dilation + H, kj * dilation:kj * dilation + W, :]
            for ki in range(kh) for kj in range(kw)]
    a = jnp.concatenate(cols, axis=-1).reshape(-1, kh * kw * Cin)
    out = matmul_bias(a, w.reshape(kh * kw * Cin, Cout), b, relu=relu)
    return out.reshape(Nb, H, W, Cout)


def maxpool2x2(x):
    """MaxPool2d(2,2): four strided NHWC slices + elementwise max (XLA-fused)."""
    Nb, H, W, C = x.shape
    x = x[:, :2 * (H // 2), :2 * (W // 2), :]
    return jnp.maximum(jnp.maximum(x[:, 0::2, 0::2, :], x[:, 0::2, 1::2, :]),
                       jnp.maximum(x[:, 1::2, 0::2, :], x[:, 1::2, 1::2, :]))


def adaptive_pool_matrix(out_size, in_size):
    m = np.zeros((out_size, in_size), np.float32)
    for i in range(out_size):
        s = (i * in_size) // out_size
        e = -(-((i + 1) * in_size) // out_size)   # ceil
        m[i, s:e] = 1.0 / (e - s)
    return m


def bilinear_matrix(out_size, in_size):
    """Bilinear interpolation weights, align_corners=True (PyTorch semantics)."""
    m = np.zeros((out_size, in_size), np.float32)
    for i in range(out_size):
        src = 0.0 if (out_size == 1 or in_size == 1) else i * (in_size - 1) / (out_size - 1)
        lo = int(math.floor(src))
        hi = min(lo + 1, in_size - 1)
        frac = src - lo
        m[i, lo] += 1.0 - frac
        m[i, hi] += frac
    return m


def apply_spatial_matrices(x, mh, mw):
    """y[n,a,b,c] = sum_{h,w} mh[a,h] mw[b,w] x[n,h,w,c]   (tiny; left to XLA/VPU)."""
    y = jnp.einsum('ah,nhwc->nawc', jnp.asarray(mh), x)
    return jnp.einsum('bw,nawc->nabc', jnp.asarray(mw), y)


# ----------------------------------------------------------------------------------
# Parameters (deterministic, in-script; kaiming-style normal for convs, zero biases)
# ----------------------------------------------------------------------------------
class ParamGen:
    def __init__(self, seed=0):
        self.key = jax.random.PRNGKey(seed)

    def conv(self, cin, cout, k):
        self.key, sub = jax.random.split(self.key)
        std = math.sqrt(2.0 / (cout * k * k))   # kaiming_normal_, mode='fan_out'
        w = jax.random.normal(sub, (k, k, cin, cout), jnp.float32) * std
        b = jnp.zeros((cout,), jnp.float32)
        return w, b


def make_params(seed=0):
    pg = ParamGen(seed)
    params = {}

    # VGG16 (cfg 'D', no BN) conv layers: 13 x (3x3, pad 1) convs.
    cfg = [(3, 64), (64, 64),
           (64, 128), (128, 128),
           (128, 256), (256, 256), (256, 256),
           (256, 512), (512, 512), (512, 512),
           (512, 512), (512, 512), (512, 512)]
    params["vgg"] = [pg.conv(ci, co, 3) for ci, co in cfg]

    def aspp_params(in_c, depth):
        return {
            "conv": pg.conv(in_c, depth, 1),    # 1x1 after global mean pool
            "atr1": pg.conv(in_c, depth, 1),
            "atr6": pg.conv(in_c, depth, 3),    # dilation 3, pad 3
            "atr12": pg.conv(in_c, depth, 3),   # dilation 5, pad 5
            "atr18": pg.conv(in_c, depth, 3),   # dilation 7, pad 7
            "out": pg.conv(depth * 5, depth, 1),
        }

    params["aspp"] = [aspp_params(c, c) for c in (64, 128, 256, 512)]

    # PPM: 4 branches of 1x1 conv (512 -> 128, no bias); fold eval-mode BN into weight.
    bn_scale = 1.0 / math.sqrt(1.0 + 1e-5)
    ppm = []
    for _ in (2, 3, 6, 9):
        w, _ = pg.conv(512, 512 // 4, 1)
        ppm.append(w * bn_scale)
    params["ppm"] = ppm
    return params


# ----------------------------------------------------------------------------------
# Module forward passes
# ----------------------------------------------------------------------------------
def aspp_forward(x, p):
    Nb, H, W, C = x.shape
    gp = jnp.mean(x, axis=(1, 2), keepdims=True)           # AdaptiveAvgPool2d((1,1))
    gp = conv2d_same(gp, *p["conv"])                        # 1x1 conv (+bias), no ReLU
    image_features = apply_spatial_matrices(
        gp, bilinear_matrix(H, 1), bilinear_matrix(W, 1))   # bilinear, align_corners=True

    a1 = conv2d_same(x, *p["atr1"])
    a6 = conv2d_same(x, *p["atr6"], dilation=3)
    a12 = conv2d_same(x, *p["atr12"], dilation=5)
    a18 = conv2d_same(x, *p["atr18"], dilation=7)

    cat = jnp.concatenate([image_features, a1, a6, a12, a18], axis=-1)
    return conv2d_same(cat, *p["out"])


def ppm_forward(x, ws, bins=(2, 3, 6, 9)):
    Nb, H, W, C = x.shape
    outs = []
    for bin_sz, w in zip(bins, ws):
        pooled = apply_spatial_matrices(x, adaptive_pool_matrix(bin_sz, H),
                                        adaptive_pool_matrix(bin_sz, W))
        zero_b = jnp.zeros((w.shape[-1],), jnp.float32)
        y = conv2d_same(pooled, w, zero_b, relu=True)       # 1x1 conv + folded BN + ReLU
        outs.append(apply_spatial_matrices(y, bilinear_matrix(H, bin_sz),
                                           bilinear_matrix(W, bin_sz)))
    return jnp.concatenate(outs, axis=-1)


def _vgg_forward_impl(x_nchw, params):
    x = jnp.transpose(x_nchw, (0, 2, 3, 1)).astype(jnp.float32)   # NCHW -> NHWC
    vgg = params["vgg"]

    # features[:4] : conv-relu-conv-relu
    x = conv2d_same(x, *vgg[0], relu=True)
    x = conv2d_same(x, *vgg[1], relu=True)
    feat1 = aspp_forward(x, params["aspp"][0])

    # features[4:9] : maxpool, 2 x conv-relu
    x = maxpool2x2(feat1)
    x = conv2d_same(x, *vgg[2], relu=True)
    x = conv2d_same(x, *vgg[3], relu=True)
    feat2 = aspp_forward(x, params["aspp"][1])

    # features[9:16]: maxpool, 3 x conv-relu
    x = maxpool2x2(feat2)
    for i in (4, 5, 6):
        x = conv2d_same(x, *vgg[i], relu=True)
    feat3 = aspp_forward(x, params["aspp"][2])

    # features[16:23]: maxpool, 3 x conv-relu
    x = maxpool2x2(feat3)
    for i in (7, 8, 9):
        x = conv2d_same(x, *vgg[i], relu=True)
    feat4 = aspp_forward(x, params["aspp"][3])

    # features[23:-1]: maxpool, 3 x conv-relu (final maxpool excluded), then PPM
    x = maxpool2x2(feat4)
    for i in (10, 11, 12):
        x = conv2d_same(x, *vgg[i], relu=True)
    feat5 = ppm_forward(x, params["ppm"])

    to_nchw = lambda f: jnp.transpose(f, (0, 3, 1, 2))
    return [to_nchw(f) for f in (feat1, feat2, feat3, feat4, feat5)]


# One jit around the whole forward: all pads/reshapes/concats fuse and the Pallas
# calls are scheduled back-to-back instead of being dispatched eagerly one by one.
vgg_forward = jax.jit(_vgg_forward_impl)


# ----------------------------------------------------------------------------------
# Kernel self-checks against pure-JAX references (loose tol: bf16 MXU inputs)
# ----------------------------------------------------------------------------------
def _close(got, ref, tol=5e-2):
    got = np.asarray(got, np.float32)
    ref = np.asarray(ref, np.float32)
    denom = max(float(np.max(np.abs(ref))), 1e-3)
    return float(np.max(np.abs(got - ref))) / denom < tol


def _check_kernels():
    key = jax.random.PRNGKey(42)
    k1, k2, k3, k4, k5 = jax.random.split(key, 5)

    # tiled GEMM (odd shapes exercise the padding paths)
    a = jax.random.normal(k1, (50, 70), jnp.float32)
    b = jax.random.normal(k2, (70, 60), jnp.float32)
    bias = jax.random.normal(k3, (60,), jnp.float32)
    got = matmul_bias(a, b, bias, relu=True)
    ref = jnp.maximum(a @ b + bias, 0.0)
    assert _close(got, ref), "matmul_bias mismatch"

    # small-M / wide-N path (im2col-fallback-like shape)
    a2 = jax.random.normal(k1, (32, 1024), jnp.float32) * 0.05
    b2 = jax.random.normal(k2, (1024, 512), jnp.float32) * 0.05
    bias2 = jnp.zeros((512,), jnp.float32)
    got = matmul_bias(a2, b2, bias2, relu=False)
    ref = a2 @ b2
    assert _close(got, ref), "matmul_bias (small-M wide-N) mismatch"

    # direct dilated 3x3 conv vs lax.conv_general_dilated
    x = jax.random.normal(k4, (2, 16, 16, 32), jnp.float32)
    w = jax.random.normal(k5, (3, 3, 32, 64), jnp.float32) * 0.1
    cb = jnp.arange(64, dtype=jnp.float32) * 0.01
    got = conv3x3_direct(x, w, cb, dilation=3, relu=False)
    ref = lax.conv_general_dilated(
        x, w, window_strides=(1, 1), padding=[(3, 3), (3, 3)],
        rhs_dilation=(3, 3),
        dimension_numbers=('NHWC', 'HWIO', 'NHWC')) + cb
    assert _close(got, ref), "conv3x3_direct mismatch"


# ----------------------------------------------------------------------------------
if __name__ == "__main__":
    _check_kernels()

    key = jax.random.PRNGKey(0)
    x = jax.random.normal(key, (2, 3, 32, 32), jnp.float32)   # NCHW like PyTorch

    params = make_params(seed=0)
    feats = vgg_forward(x, params)
    feats = [jax.block_until_ready(f) for f in feats]

    expected = [(2, 64, 32, 32), (2, 128, 16, 16), (2, 256, 8, 8),
                (2, 512, 4, 4), (2, 512, 2, 2)]
    assert [tuple(f.shape) for f in feats] == expected, [f.shape for f in feats]
    assert all(bool(jnp.all(jnp.isfinite(f))) for f in feats)
    print("KERNEL_OK")
</pallas_src>

<mosaic_0001>
module attributes {stable_mosaic.version = 11 : i64} {
  func.func @kernel(%arg0: i32, %arg1: i32, %arg2: i32, %arg3: memref<56x70xbf16, #tpu.memory_space<vmem>>, %arg4: memref<70x60xbf16, #tpu.memory_space<vmem>>, %arg5: memref<1x60xf32, #tpu.memory_space<vmem>>, %arg6: memref<56x60xf32, #tpu.memory_space<vmem>>, %arg7: memref<56x60xf32, #tpu.memory_space<vmem>>) attributes {dimension_semantics = [#tpu.dimension_semantics<parallel>, #tpu.dimension_semantics<parallel>, #tpu.dimension_semantics<arbitrary>], iteration_bounds = array<i64: 1, 1, 1>, scalar_prefetch = 0 : i64, scratch_operands = 1 : i64, tpu.core_type = #tpu.core_type<tc>, window_params = [{transform_indices = @transform_0, window_bounds = array<i64: 56, 70>}, {transform_indices = @transform_1, window_bounds = array<i64: 70, 60>}, {transform_indices = @transform_2, window_bounds = array<i64: 1, 60>}, {transform_indices = @transform_3, window_bounds = array<i64: 56, 60>}]} {
    %c0_i32 = arith.constant 0 : i32
    %0 = arith.cmpi eq, %arg2, %c0_i32 : i32
    %1 = arith.extui %0 : i1 to i32
    %c0_i32_0 = arith.constant 0 : i32
    %2 = arith.cmpi ne, %1, %c0_i32_0 : i32
    scf.if %2 {
      %c0_10 = arith.constant 0 : index
      %c0_11 = arith.constant 0 : index
      %12 = vector.load %arg5[%c0_10, %c0_11] : memref<1x60xf32, #tpu.memory_space<vmem>>, vector<1x60xf32>
      %13 = vector.shape_cast %12 : vector<1x60xf32> to vector<1x60xf32>
      %14 = vector.broadcast %13 : vector<1x60xf32> to vector<56x60xf32>
      %c0_12 = arith.constant 0 : index
      %c0_13 = arith.constant 0 : index
      %15 = vector.load %arg7[%c0_12, %c0_13] : memref<56x60xf32, #tpu.memory_space<vmem>>, vector<56x60xf32>
      tpu.vector_store %arg7[%c0_12, %c0_13], %14 {strides = array<i32>} : memref<56x60xf32, #tpu.memory_space<vmem>>, vector<56x60xf32>,
    } else {
    }
    %c0 = arith.constant 0 : index
    %c0_1 = arith.constant 0 : index
    %3 = vector.load %arg7[%c0, %c0_1] : memref<56x60xf32, #tpu.memory_space<vmem>>, vector<56x60xf32>
    %c0_2 = arith.constant 0 : index
    %c0_3 = arith.constant 0 : index
    %4 = vector.load %arg3[%c0_2, %c0_3] : memref<56x70xbf16, #tpu.memory_space<vmem>>, vector<56x70xbf16>
    %c0_4 = arith.constant 0 : index
    %c0_5 = arith.constant 0 : index
    %5 = vector.load %arg4[%c0_4, %c0_5] : memref<70x60xbf16, #tpu.memory_space<vmem>>, vector<70x60xbf16>
    %cst = arith.constant dense<0.000000e+00> : vector<56x60xf32>
    %6 = tpu.matmul %4, %5, %cst {dimension_numbers = #tpu.dot_dimension_numbers<[1], [0], [0], [1], [0, 0, 1, 1], [], []>} : vector<56x70xbf16>, vector<70x60xbf16>, vector<56x60xf32> -> vector<56x60xf32>
    %7 = arith.addf %3, %6 : vector<56x60xf32>
    %c0_6 = arith.constant 0 : index
    %c0_7 = arith.constant 0 : index
    %8 = vector.load %arg7[%c0_6, %c0_7] : memref<56x60xf32, #tpu.memory_space<vmem>>, vector<56x60xf32>
    tpu.vector_store %arg7[%c0_6, %c0_7], %7 {strides = array<i32>} : memref<56x60xf32, #tpu.memory_space<vmem>>, vector<56x60xf32>,
    %c0_i32_8 = arith.constant 0 : i32
    %9 = arith.cmpi eq, %arg2, %c0_i32_8 : i32
    %10 = arith.extui %9 : i1 to i32
    %c0_i32_9 = arith.constant 0 : i32
    %11 = arith.cmpi ne, %10, %c0_i32_9 : i32
    scf.if %11 {
      %c0_10 = arith.constant 0 : index
      %c0_11 = arith.constant 0 : index
      %12 = vector.load %arg7[%c0_10, %c0_11] : memref<56x60xf32, #tpu.memory_space<vmem>>, vector<56x60xf32>
      %cst_12 = arith.constant 0.000000e+00 : f32
      %13 = vector.broadcast %cst_12 : f32 to vector<56x60xf32>
      %14 = arith.maximumf %12, %13 : vector<56x60xf32>
      %c0_13 = arith.constant 0 : index
      %c0_14 = arith.constant 0 : index
      %15 = vector.load %arg6[%c0_13, %c0_14] : memref<56x60xf32, #tpu.memory_space<vmem>>, vector<56x60xf32>
      tpu.vector_store %arg6[%c0_13, %c0_14], %14 {strides = array<i32>} : memref<56x60xf32, #tpu.memory_space<vmem>>, vector<56x60xf32>,
    } else {
    }
    return
  }
  func.func @transform_0(%arg0: i32, %arg1: i32, %arg2: i32) -> (i32, i32) {
    %c0_i32 = arith.constant 0 : i32
    return %arg0, %arg2 : i32, i32
  }
  func.func @transform_1(%arg0: i32, %arg1: i32, %arg2: i32) -> (i32, i32) {
    %c0_i32 = arith.constant 0 : i32
    return %arg2, %arg1 : i32, i32
  }
  func.func @transform_2(%arg0: i32, %arg1: i32, %arg2: i32) -> (i32, i32) {
    %c0_i32 = arith.constant 0 : i32
    %c0_i32_0 = arith.constant 0 : i32
    return %c0_i32, %arg1 : i32, i32
  }
  func.func @transform_3(%arg0: i32, %arg1: i32, %arg2: i32) -> (i32, i32) {
    %c0_i32 = arith.constant 0 : i32
    return %arg0, %arg1 : i32, i32
  }
}

</mosaic_0001>

<bundles_post_ra>
// kernel: tpu_custom_call.1
= control target key start
LH: loop header
LB: loop body
LE: loop exit
PB: predicated region body
PF: predicated region fallthrough
CT: control target
= control target key end

     0   :  { %vm103_vm0 = vcmask 572416   ;;  %vm27_vm1 = vcmask 490496   ;;  %s418_s0 = inlined_call_operand.vmem [shape: bf16[56,70], index: 0, kind: input, shape index: {}]   ;;  %s419_s1 = inlined_call_operand.vmem [shape: bf16[70,60], index: 1, kind: input, shape index: {}]   ;;  %s420_s2 = inlined_call_operand.vmem [shape: f32[1,60], index: 2, kind: input, shape index: {}]   ;;  %s421_s3 = inlined_call_operand.hbm [shape: f32[56,60], index: 3, kind: output, shape index: {}]  }
   0x1   :  { %v295_v0 = vld [vmem:[%s419_s1] sm:$0xff]   ;;  %v296_v1 = vld [vmem:[%s419_s1 + $0x8] sm:$0xff]   ;;  %v297_v2 = vld [vmem:[%s419_s1 + $0x10] sm:$0xff]  }
   0x2   :  { %262 = vmatprep.subr.bf16.mxu0 %v295_v0  ;;  %280 = vmatprep.subr.bf16.mxu1 %v295_v0  ;;  %v300_v3 = vld [vmem:[%s418_s0] sm:$0xff]   ;;  %v301_v4 = vld [vmem:[%s418_s0 + $0x10] sm:$0xff]   ;;  %v298_v5 = vld [vmem:[%s419_s1 + $0x18] sm:$0xff]  }
   0x3   :  { %263 = vmatpush3.bf16.msra.mxu0 %v295_v0  ;;  %285 = vmatpush3.bf16.msra.mxu1 %v295_v0  ;;  %v239_v6 = vld [vmem:[%s420_s2] ss:$0 sm:$0xff] }
   0x4   :  { %264 = vmatprep.subr.bf16.mxu0 %v296_v1  ;;  %281 = vmatprep.subr.bf16.mxu1 %v296_v1 }
   0x5   :  { %272 = vmatprep.mubr.msk.bf16.mxu0 %vm103_vm0, %v300_v3 }
   0x7   :  { %265 = vmatpush3.bf16.msra.mxu0 %v296_v1  ;;  %286 = vmatpush3.bf16.msra.mxu1 %v296_v1 }
   0x8   :  { %266 = vmatprep.subr.bf16.mxu0 %v297_v2  ;;  %282 = vmatprep.subr.bf16.mxu1 %v297_v2 }
   0x9   :  { %8 = vsyncpa [#allocation4], 0  ;;  %276 = vmatprep.mubr.msk.bf16.mxu1 %vm103_vm0, %v301_v4  ;;  %30 = vst.msk [vmem:[#allocation2 + $0x10] sm:$0xff] %vm27_vm1, %v239_v6  ;;  %v299_v7 = vld [vmem:[%s419_s1 + $0x20] ss:$0 sps:$4 sm:$0x77]  }
   0xa   :  { %28 = vst.msk [vmem:[#allocation2] sm:$0xff] %vm27_vm1, %v239_v6  ;;  %29 = vst.msk [vmem:[#allocation2 + $0x8] sm:$0xff] %vm27_vm1, %v239_v6  ;;  %vm116_vm2 = vcmask 1042432   ;;  %v302_v9 = vld [vmem:[%s418_s0 + $0x8] sm:$0xff]   ;;  %v303_v10 = vld [vmem:[%s418_s0 + $0x18] ss:$0 sps:$4 sm:$0xff]  }
   0xb   :  { %31 = vst.msk [vmem:[#allocation2 + $0x18] sm:$0xff] %vm27_vm1, %v239_v6  ;;  %32 = vst.msk [vmem:[#allocation2 + $0x20] sm:$0xff] %vm27_vm1, %v239_v6  ;;  %267 = vmatpush3.bf16.msra.mxu0 %v297_v2  ;;  %287 = vmatpush3.bf16.msra.mxu1 %v297_v2  ;;  %v118_v8 = vsel %vm116_vm2, %v299_v7, 0  ;;  %s328_s0 = smov [#allocation3]  }
   0xc   :  { %33 = vst.msk [vmem:[#allocation2 + $0x28] sm:$0xff] %vm27_vm1, %v239_v6  ;;  %34 = vst.msk [vmem:[#allocation2 + $0x30] sm:$0xff] %vm27_vm1, %v239_v6  ;;  %268 = vmatprep.subr.bf16.mxu0 %v298_v5  ;;  %283 = vmatprep.subr.bf16.mxu1 %v298_v5  ;;  %s228_s1 = sshll.u32 %s328_s0, 4  ;;  %s229_s1 = int_to_ptr.vmem [resolvable:$true] %s228_s1 }
   0xd   :  { %s304_s4 = scalar_lea.vmem %s229_s1, 896  ;;  %p309_p1 = scmp.lt.s32.totalorder %s229_s1, %s229_s1 }
   0xe   :  { %p305_p0 = scmp.ne.s32.totalorder %s229_s1, %s304_s4  ;;  %p310_p2 = scmp.lt.s32.totalorder %s304_s4, %s304_s4 }
   0xf   :  { %269 = vmatpush3.bf16.msra.mxu0 %v298_v5  ;;  %288 = vmatpush3.bf16.msra.mxu1 %v298_v5 }
  0x10   :  { %290 = vmatprep.subr.msk.bf16.mxu0 %vm116_vm2, %v299_v7  ;;  %291 = vmatprep.subr.msk.bf16.mxu1 %vm116_vm2, %v299_v7  ;;  %v37_v11 = vld [vmem:[#allocation2 + $0x10] sm:$0xff]  ;;  %p311_p3 = por %p310_p2, %p309_p1 }
  0x11   :  { %v35_v13 = vld [vmem:[#allocation2] sm:$0xff]  ;;  %v36_v22 = vld [vmem:[#allocation2 + $0x8] sm:$0xff] }
  0x12   :  { %v39_v14 = vld [vmem:[#allocation2 + $0x20] sm:$0xff]  ;;  %v38_v17 = vld [vmem:[#allocation2 + $0x18] sm:$0xff]  ;;  %p312_p4 = pnand %p311_p3, %p305_p0 }
  0x13   :  { %271 = vmatpush3.bf16.msra.mxu0 %v118_v8  ;;  %289 = vmatpush3.bf16.msra.mxu1 %v118_v8  ;;  %v41_v12 = vld [vmem:[#allocation2 + $0x30] sm:$0xff]  ;;  %v40_v23 = vld [vmem:[#allocation2 + $0x28] sm:$0xff] }
  0x16   :  { %273 = vmatmul.mubr.msk.bf16.vlgmr.msra.gmra.mrb[0].mxu0 %vm103_vm0, %v302_v9  ;;  %277 = vmatmul.mubr.msk.bf16.vlgmr.msra.gmra.mrb[0].mxu1 %vm103_vm0, %v303_v10 }
  0xe9   :  { %v274_v15 = vpop.f32.mrb[0].mxu0  ;;  %v278_v16 = vpop.f32.mrb[0].mxu1 }
  0xea   :  { %v186_v18 = vadd.f32 %v274_v15, %v37_v11  ;;  %v190_v19 = vadd.f32 %v278_v16, %v41_v12  ;;  %v154_v20 = vpop.f32.mrb[1].mxu0  ;;  %v170_v21 = vpop.f32.mrb[1].mxu1 }
  0xeb   :  { %v184_v24 = vadd.f32 %v154_v20, %v35_v13  ;;  %v188_v25 = vadd.f32 %v170_v21, %v39_v14  ;;  %v275_v26 = vpop.f32.mrb[2].mxu0  ;;  %v279_v27 = vpop.f32.mrb[2].mxu1 }
  0xec   :  { %194 = vst.msk [vmem:[#allocation2 + $0x10] sm:$0xff] %vm27_vm1, %v186_v18  ;;  %198 = vst.msk [vmem:[#allocation2 + $0x30] sm:$0xff] %vm27_vm1, %v190_v19  ;;  %v187_v28 = vadd.f32 %v275_v26, %v38_v17  ;;  %v157_v29 = vpop.f32.mrb[3].mxu0  ;;  %v173_v30 = vpop.f32.mrb[3].mxu1 }
  0xed   :  { %192 = vst.msk [vmem:[#allocation2] sm:$0xff] %vm27_vm1, %v184_v24  ;;  %196 = vst.msk [vmem:[#allocation2 + $0x20] sm:$0xff] %vm27_vm1, %v188_v25  ;;  %v185_v31 = vadd.f32 %v157_v29, %v36_v22  ;;  %v189_v32 = vadd.f32 %v173_v30, %v40_v23 }
  0xee   :  { %195 = vst.msk [vmem:[#allocation2 + $0x18] sm:$0xff] %vm27_vm1, %v187_v28 }
  0xef   :  { %193 = vst.msk [vmem:[#allocation2 + $0x8] sm:$0xff] %vm27_vm1, %v185_v31  ;;  %197 = vst.msk [vmem:[#allocation2 + $0x28] sm:$0xff] %vm27_vm1, %v189_v32 }
  0xf3   :  { %v204_v33 = vld [vmem:[#allocation2 + $0x10] sm:$0xff] }
  0xf4   :  { %v208_v34 = vld [vmem:[#allocation2 + $0x30] sm:$0xff]  ;;  %v202_v35 = vld [vmem:[#allocation2] sm:$0xff]  ;;  %v211_v37 = vmax.f32 %v204_v33, 0.0 }
  0xf5   :  { %v206_v36 = vld [vmem:[#allocation2 + $0x20] sm:$0xff]  ;;  %v215_v38 = vmax.f32 %v208_v34, 0.0  ;;  %v205_v39 = vld [vmem:[#allocation2 + $0x18] sm:$0xff]  ;;  %v209_v40 = vmax.f32 %v202_v35, 0.0 }
  0xf6   :  { %v213_v41 = vmax.f32 %v206_v36, 0.0  ;;  %v203_v42 = vld [vmem:[#allocation2 + $0x8] sm:$0xff]  ;;  %v212_v44 = vmax.f32 %v205_v39, 0.0  ;;  %218 = vst.msk [vmem:[#allocation3 + $0x10] sm:$0xff] %vm27_vm1, %v211_v37 }
  0xf7   :  { %v207_v43 = vld [vmem:[#allocation2 + $0x28] sm:$0xff]  ;;  %222 = vst.msk [vmem:[#allocation3 + $0x30] sm:$0xff] %vm27_vm1, %v215_v38  ;;  %v210_v45 = vmax.f32 %v203_v42, 0.0  ;;  %216 = vst.msk [vmem:[#allocation3] sm:$0xff] %vm27_vm1, %v209_v40 }
  0xf8   :  { %v214_v46 = vmax.f32 %v207_v43, 0.0  ;;  %220 = vst.msk [vmem:[#allocation3 + $0x20] sm:$0xff] %vm27_vm1, %v213_v41  ;;  %219 = vst.msk [vmem:[#allocation3 + $0x18] sm:$0xff] %vm27_vm1, %v212_v44 }
  0xf9   :  { %217 = vst.msk [vmem:[#allocation3 + $0x8] sm:$0xff] %vm27_vm1, %v210_v45 }
  0xfa   :  { %221 = vst.msk [vmem:[#allocation3 + $0x28] sm:$0xff] %vm27_vm1, %v214_v46 }
  0xfb   :  { %315 = shalt.err (!%p312_p4)
}
  0xfc   :  { %s316_s7 = scalar_lea.hbm %s421_s3, 896 }
  0xfd   :  { %p317_p5 = scmp.ne.s32.totalorder %s421_s3, %s316_s7  ;;  %p320_p6 = scmp.lt.u32.totalorder %s316_s7, %s421_s3 }
  0xff   :  { %p322_p7 = pnand %p320_p6, %p317_p5 }
 0x101   :  { %325 = shalt.err (!%p322_p7)
}
 0x102   :  { %s329_s12 = smov 128   ;;  %s330_s13 = smov 8  }
 0x103   :  { %234 = dma.vmem_to_hbm [thread:$0]  %s229_s1, 896, %s421_s3, [#allocation4], %s329_s12, %s329_s12, %s330_s13  }
 0x104   :  { %326 = dma.done.wait [#allocation4], 896  }
 0x105   :  { %327 = vsyncadd [#allocation4], 4294966400 }
 0x106   :  { %238 = vsyncpa [#allocation4], 1 }

</bundles_post_ra>
